<compile_context>
chip_gen: v7x
topology: tpu7x:2x2x1
jax: 0.10.0
libtpu: 0.0.40
codegen_flags: <defaults>
</compile_context>

<pallas_src>
import jax
import jax.numpy as jnp
from jax.experimental import pallas as pl
from jax.experimental.pallas import tpu as pltpu


def _round_up(x: int, m: int) -> int:
    return ((x + m - 1) // m) * m


# ---------------------------------------------------------------------------
# Kernel A (grid = (row tiles [parallel], contraction tiles [arbitrary])):
#   ax_acc       += Ahat[rows, cols] @ X[cols, :]            (f32 VMEM accumulator)
#   hw2[rows, :]  = relu(ax_acc @ W1 + b1) @ W2              (on last contraction tile)
# bf16 MXU inputs, f32 accumulation; bias/ReLU in f32.
# ---------------------------------------------------------------------------
def gcn_rows_kernel(a_ref, x_ref, w1_ref, b1_ref, w2_ref, hw2_ref, ax_ref):
    k = pl.program_id(1)

    @pl.when(k == 0)
    def _init():
        ax_ref[...] = jnp.zeros_like(ax_ref)

    ax_ref[...] += jnp.dot(a_ref[...], x_ref[...],
                           preferred_element_type=jnp.float32)          # [tm, F] f32

    @pl.when(k == pl.num_programs(1) - 1)
    def _finalize():
        h1 = jnp.dot(ax_ref[...].astype(jnp.bfloat16), w1_ref[...],
                     preferred_element_type=jnp.float32)                # [tm, Hp]
        h1 = jnp.maximum(h1 + b1_ref[...], 0.0)                         # bias + ReLU (f32 VPU)
        hw2 = jnp.dot(h1.astype(jnp.bfloat16), w2_ref[...],
                      preferred_element_type=jnp.float32)               # [tm, Hp]
        hw2_ref[...] = hw2.astype(hw2_ref.dtype)                        # store bf16


# ---------------------------------------------------------------------------
# Kernel B (reduction grid over node row tiles, VMEM f32 accumulator):
#   pooled = (P @ Ahat) @ hw2 + b2      (rows of P sum to 1, so bias folds in)
#   out    = pooled @ Wlin + blin       (lane-dense (Bp, Cp) store)
# ---------------------------------------------------------------------------
def pool_head_kernel(pa_ref, hw2_ref, b2_ref, wl_ref, bl_ref, out_ref, acc_ref):
    k = pl.program_id(0)

    @pl.when(k == 0)
    def _init():
        acc_ref[...] = jnp.zeros_like(acc_ref)

    acc_ref[...] += jnp.dot(pa_ref[...], hw2_ref[...],
                            preferred_element_type=jnp.float32)         # [Bp, Hp]

    @pl.when(k == pl.num_programs(0) - 1)
    def _finalize():
        pooled = acc_ref[...] + b2_ref[...]                             # f32
        out = jnp.dot(pooled.astype(jnp.bfloat16), wl_ref[...],
                      preferred_element_type=jnp.float32) + bl_ref[...]
        out_ref[...] = out.astype(out_ref.dtype)


def gps_forward(x, edge_index, batch, params, num_graphs):
    N, F = x.shape
    H = params["w1"].shape[1]
    C = params["wlin"].shape[1]

    # ----- padded / tiled sizes (lane=128, sublane=8, bf16 pack=16) -----
    Hp = _round_up(H, 128)
    Cp = _round_up(C, 128)
    Bp = _round_up(num_graphs, 8)

    if N > 512:
        tile_m, tile_k = 256, 512          # fixed tiles -> VMEM use independent of N
    else:
        tile_m = _round_up(N, 16)          # bf16 sublane-pack friendly
        tile_k = _round_up(N, 128)         # lane-dense contraction
    Nr = _round_up(N, tile_m)              # Ahat rows / hw2 rows / PA cols
    Nc = _round_up(N, tile_k)              # Ahat cols / X rows
    n_row_tiles = Nr // tile_m
    n_col_tiles = Nc // tile_k

    # ----- glue (plain JAX): normalized adjacency & mean-pooling matrix -----
    src, dst = edge_index[0], edge_index[1]
    A = jnp.zeros((N, N), jnp.float32).at[src, dst].set(1.0)
    eye = jnp.eye(N, dtype=jnp.float32)
    A = A * (1.0 - eye) + eye              # drop existing self loops, add exactly one
    deg = jnp.sum(A, axis=1)
    dinv = jnp.where(deg > 0, jax.lax.rsqrt(deg), 0.0)
    Ahat = dinv[:, None] * A * dinv[None, :]

    onehot = (batch[None, :] == jnp.arange(num_graphs)[:, None]).astype(jnp.float32)
    counts = jnp.maximum(jnp.sum(onehot, axis=1, keepdims=True), 1.0)
    P = onehot / counts                    # [B, N], rows sum to 1
    PA = P @ Ahat                          # [B, N]  (pool o aggregate), cheap vs N^2*H

    # ----- pad to tile-friendly shapes, cast MXU operands to bf16 -----
    bf = jnp.bfloat16
    Ahat_p = jnp.zeros((Nr, Nc), bf).at[:N, :N].set(Ahat.astype(bf))
    x_p    = jnp.zeros((Nc, F), bf).at[:N, :].set(x.astype(bf))
    PA_p   = jnp.zeros((Bp, Nr), bf).at[:num_graphs, :N].set(PA.astype(bf))
    w1_p   = jnp.zeros((F, Hp), bf).at[:, :H].set(params["w1"].astype(bf))
    w2_p   = jnp.zeros((Hp, Hp), bf).at[:H, :H].set(params["w2"].astype(bf))
    wl_p   = jnp.zeros((Hp, Cp), bf).at[:H, :C].set(params["wlin"].astype(bf))
    b1_p   = jnp.zeros((1, Hp), jnp.float32).at[:, :H].set(params["b1"])
    b2_p   = jnp.zeros((1, Hp), jnp.float32).at[:, :H].set(params["b2"])
    bl_p   = jnp.zeros((1, Cp), jnp.float32).at[:, :C].set(params["blin"])

    # ----- kernel A: row-tiled GCN layers (parallel rows x arbitrary contraction) -----
    hw2 = pl.pallas_call(
        gcn_rows_kernel,
        out_shape=jax.ShapeDtypeStruct((Nr, Hp), bf),
        grid_spec=pltpu.PrefetchScalarGridSpec(
            num_scalar_prefetch=0,
            grid=(n_row_tiles, n_col_tiles),
            in_specs=[
                pl.BlockSpec((tile_m, tile_k), lambda i, k: (i, k)),   # Ahat tile
                pl.BlockSpec((tile_k, F),      lambda i, k: (k, 0)),   # X column-tile rows
                pl.BlockSpec((F, Hp),          lambda i, k: (0, 0)),   # W1
                pl.BlockSpec((1, Hp),          lambda i, k: (0, 0)),   # b1
                pl.BlockSpec((Hp, Hp),         lambda i, k: (0, 0)),   # W2
            ],
            out_specs=pl.BlockSpec((tile_m, Hp), lambda i, k: (i, 0)),
            scratch_shapes=[pltpu.VMEM((tile_m, F), jnp.float32)],     # Ahat@X accumulator
        ),
        compiler_params=pltpu.CompilerParams(
            dimension_semantics=("parallel", "arbitrary"),
            vmem_limit_bytes=32 * 1024 * 1024),
    )(Ahat_p, x_p, w1_p, b1_p, w2_p)

    # ----- kernel B: pooled aggregation + linear head (reduction grid axis) -----
    out_pad = pl.pallas_call(
        pool_head_kernel,
        out_shape=jax.ShapeDtypeStruct((Bp, Cp), jnp.float32),
        grid_spec=pltpu.PrefetchScalarGridSpec(
            num_scalar_prefetch=0,
            grid=(n_row_tiles,),
            in_specs=[
                pl.BlockSpec((Bp, tile_m), lambda k: (0, k)),   # (P @ Ahat) column tile
                pl.BlockSpec((tile_m, Hp), lambda k: (k, 0)),   # hw2 row tile
                pl.BlockSpec((1, Hp),      lambda k: (0, 0)),   # b2
                pl.BlockSpec((Hp, Cp),     lambda k: (0, 0)),   # Wlin
                pl.BlockSpec((1, Cp),      lambda k: (0, 0)),   # blin
            ],
            out_specs=pl.BlockSpec((Bp, Cp), lambda k: (0, 0)),
            scratch_shapes=[pltpu.VMEM((Bp, Hp), jnp.float32)],
        ),
        compiler_params=pltpu.CompilerParams(
            dimension_semantics=("arbitrary",),
            vmem_limit_bytes=32 * 1024 * 1024),
    )(PA_p, hw2, b2_p, wl_p, bl_p)

    return out_pad[:num_graphs, :C]


def reference_forward(x, edge_index, batch, params, num_graphs):
    """Pure-JAX f32 reference with identical semantics (for a loose numeric check)."""
    N = x.shape[0]
    src, dst = edge_index[0], edge_index[1]
    A = jnp.zeros((N, N), jnp.float32).at[src, dst].set(1.0)
    eye = jnp.eye(N, dtype=jnp.float32)
    A = A * (1.0 - eye) + eye
    deg = jnp.sum(A, axis=1)
    dinv = jnp.where(deg > 0, jax.lax.rsqrt(deg), 0.0)
    Ahat = dinv[:, None] * A * dinv[None, :]
    h = jnp.maximum(Ahat @ (x @ params["w1"]) + params["b1"], 0.0)
    h = Ahat @ (h @ params["w2"]) + params["b2"]
    onehot = (batch[None, :] == jnp.arange(num_graphs)[:, None]).astype(jnp.float32)
    counts = jnp.maximum(jnp.sum(onehot, axis=1, keepdims=True), 1.0)
    g = (onehot / counts) @ h
    return g @ params["wlin"] + params["blin"]


def init_params(key, in_features, hidden_channels, num_classes):
    ks = jax.random.split(key, 6)

    def glorot(k, shape):
        fan_in, fan_out = shape
        lim = jnp.sqrt(6.0 / (fan_in + fan_out))
        return jax.random.uniform(k, shape, jnp.float32, -lim, lim)

    return {
        "w1": glorot(ks[0], (in_features, hidden_channels)),
        "b1": jax.random.uniform(ks[1], (1, hidden_channels), jnp.float32, -0.1, 0.1),
        "w2": glorot(ks[2], (hidden_channels, hidden_channels)),
        "b2": jax.random.uniform(ks[3], (1, hidden_channels), jnp.float32, -0.1, 0.1),
        "wlin": glorot(ks[4], (hidden_channels, num_classes)),
        "blin": jax.random.uniform(ks[5], (1, num_classes), jnp.float32, -0.1, 0.1),
    }


if __name__ == "__main__":
    key = jax.random.PRNGKey(0)
    in_features, hidden_channels, num_classes = 8, 32, 4
    N = 16            # total nodes across both graphs
    num_graphs = 2    # nodes 0..7 -> graph 0, nodes 8..15 -> graph 1

    kx, kp = jax.random.split(key)
    x = jax.random.normal(kx, (N, in_features), jnp.float32)

    # deterministic symmetric edges: ring within each 8-node graph + one chord
    def ring_edges(offset, n):
        s = [offset + i for i in range(n)]
        d = [offset + (i + 1) % n for i in range(n)]
        s += [offset + 0]
        d += [offset + n // 2]
        return s + d, d + s   # symmetrize

    s0, d0 = ring_edges(0, 8)
    s1, d1 = ring_edges(8, 8)
    edge_index = jnp.array([s0 + s1, d0 + d1], dtype=jnp.int32)
    batch = jnp.array([0] * 8 + [1] * 8, dtype=jnp.int32)

    params = init_params(kp, in_features, hidden_channels, num_classes)

    out = gps_forward(x, edge_index, batch, params, num_graphs)
    out = jax.block_until_ready(out)

    assert out.shape == (num_graphs, num_classes)
    assert bool(jnp.all(jnp.isfinite(out)))

    # loose check vs f32 reference (kernel uses bf16 MXU inputs)
    ref = reference_forward(x, edge_index, batch, params, num_graphs)
    max_err = float(jnp.max(jnp.abs(out - ref)))
    assert max_err < 0.1, f"max abs error vs reference too large: {max_err}"

    print("KERNEL_OK")
</pallas_src>

<mosaic_0001>
module attributes {stable_mosaic.version = 11 : i64} {
  func.func @gcn_rows_kernel(%arg0: i32, %arg1: i32, %arg2: memref<16x128xbf16, #tpu.memory_space<vmem>>, %arg3: memref<128x8xbf16, #tpu.memory_space<vmem>>, %arg4: memref<8x128xbf16, #tpu.memory_space<vmem>>, %arg5: memref<1x128xf32, #tpu.memory_space<vmem>>, %arg6: memref<128x128xbf16, #tpu.memory_space<vmem>>, %arg7: memref<16x128xbf16, #tpu.memory_space<vmem>>, %arg8: memref<16x8xf32, #tpu.memory_space<vmem>>) attributes {dimension_semantics = [#tpu.dimension_semantics<parallel>, #tpu.dimension_semantics<arbitrary>], iteration_bounds = array<i64: 1, 1>, scalar_prefetch = 0 : i64, scratch_operands = 1 : i64, tpu.core_type = #tpu.core_type<tc>, window_params = [{transform_indices = @transform_0, window_bounds = array<i64: 16, 128>}, {transform_indices = @transform_1, window_bounds = array<i64: 128, 8>}, {pipeline_mode = #tpu.pipeline_mode<synchronous>, transform_indices = @transform_2, window_bounds = array<i64: 8, 128>}, {pipeline_mode = #tpu.pipeline_mode<synchronous>, transform_indices = @transform_3, window_bounds = array<i64: 1, 128>}, {pipeline_mode = #tpu.pipeline_mode<synchronous>, transform_indices = @transform_4, window_bounds = array<i64: 128, 128>}, {transform_indices = @transform_5, window_bounds = array<i64: 16, 128>}]} {
    %c0_i32 = arith.constant 0 : i32
    %0 = arith.cmpi eq, %arg1, %c0_i32 : i32
    %1 = arith.extui %0 : i1 to i32
    %c0_i32_0 = arith.constant 0 : i32
    %2 = arith.cmpi ne, %1, %c0_i32_0 : i32
    scf.if %2 {
      %cst_10 = arith.constant 0.000000e+00 : f32
      %12 = vector.broadcast %cst_10 : f32 to vector<16x8xf32>
      %c0_11 = arith.constant 0 : index
      %c0_12 = arith.constant 0 : index
      %13 = vector.load %arg8[%c0_11, %c0_12] : memref<16x8xf32, #tpu.memory_space<vmem>>, vector<16x8xf32>
      tpu.vector_store %arg8[%c0_11, %c0_12], %12 {strides = array<i32>} : memref<16x8xf32, #tpu.memory_space<vmem>>, vector<16x8xf32>,
    } else {
    }
    %c0 = arith.constant 0 : index
    %c0_1 = arith.constant 0 : index
    %3 = vector.load %arg8[%c0, %c0_1] : memref<16x8xf32, #tpu.memory_space<vmem>>, vector<16x8xf32>
    %c0_2 = arith.constant 0 : index
    %c0_3 = arith.constant 0 : index
    %4 = vector.load %arg2[%c0_2, %c0_3] : memref<16x128xbf16, #tpu.memory_space<vmem>>, vector<16x128xbf16>
    %c0_4 = arith.constant 0 : index
    %c0_5 = arith.constant 0 : index
    %5 = vector.load %arg3[%c0_4, %c0_5] : memref<128x8xbf16, #tpu.memory_space<vmem>>, vector<128x8xbf16>
    %cst = arith.constant dense<0.000000e+00> : vector<16x8xf32>
    %6 = tpu.matmul %4, %5, %cst {dimension_numbers = #tpu.dot_dimension_numbers<[1], [0], [0], [1], [0, 0, 1, 1], [], []>} : vector<16x128xbf16>, vector<128x8xbf16>, vector<16x8xf32> -> vector<16x8xf32>
    %7 = arith.addf %3, %6 : vector<16x8xf32>
    %c0_6 = arith.constant 0 : index
    %c0_7 = arith.constant 0 : index
    %8 = vector.load %arg8[%c0_6, %c0_7] : memref<16x8xf32, #tpu.memory_space<vmem>>, vector<16x8xf32>
    tpu.vector_store %arg8[%c0_6, %c0_7], %7 {strides = array<i32>} : memref<16x8xf32, #tpu.memory_space<vmem>>, vector<16x8xf32>,
    %c0_i32_8 = arith.constant 0 : i32
    %9 = arith.cmpi eq, %arg1, %c0_i32_8 : i32
    %10 = arith.extui %9 : i1 to i32
    %c0_i32_9 = arith.constant 0 : i32
    %11 = arith.cmpi ne, %10, %c0_i32_9 : i32
    scf.if %11 {
      %c0_10 = arith.constant 0 : index
      %c0_11 = arith.constant 0 : index
      %12 = vector.load %arg8[%c0_10, %c0_11] : memref<16x8xf32, #tpu.memory_space<vmem>>, vector<16x8xf32>
      %13 = arith.truncf %12 : vector<16x8xf32> to vector<16x8xbf16>
      %c0_12 = arith.constant 0 : index
      %c0_13 = arith.constant 0 : index
      %14 = vector.load %arg4[%c0_12, %c0_13] : memref<8x128xbf16, #tpu.memory_space<vmem>>, vector<8x128xbf16>
      %cst_14 = arith.constant dense<0.000000e+00> : vector<16x128xf32>
      %15 = tpu.matmul %13, %14, %cst_14 {dimension_numbers = #tpu.dot_dimension_numbers<[1], [0], [0], [1], [0, 0, 1, 1], [], []>} : vector<16x8xbf16>, vector<8x128xbf16>, vector<16x128xf32> -> vector<16x128xf32>
      %c0_15 = arith.constant 0 : index
      %c0_16 = arith.constant 0 : index
      %16 = vector.load %arg5[%c0_15, %c0_16] : memref<1x128xf32, #tpu.memory_space<vmem>>, vector<1x128xf32>
      %17 = vector.broadcast %16 : vector<1x128xf32> to vector<16x128xf32>
      %18 = arith.addf %15, %17 : vector<16x128xf32>
      %cst_17 = arith.constant 0.000000e+00 : f32
      %19 = vector.broadcast %cst_17 : f32 to vector<16x128xf32>
      %20 = arith.maximumf %18, %19 : vector<16x128xf32>
      %21 = arith.truncf %20 : vector<16x128xf32> to vector<16x128xbf16>
      %c0_18 = arith.constant 0 : index
      %c0_19 = arith.constant 0 : index
      %22 = vector.load %arg6[%c0_18, %c0_19] : memref<128x128xbf16, #tpu.memory_space<vmem>>, vector<128x128xbf16>
      %cst_20 = arith.constant dense<0.000000e+00> : vector<16x128xf32>
      %23 = tpu.matmul %21, %22, %cst_20 {dimension_numbers = #tpu.dot_dimension_numbers<[1], [0], [0], [1], [0, 0, 1, 1], [], []>} : vector<16x128xbf16>, vector<128x128xbf16>, vector<16x128xf32> -> vector<16x128xf32>
      %24 = arith.truncf %23 : vector<16x128xf32> to vector<16x128xbf16>
      %c0_21 = arith.constant 0 : index
      %c0_22 = arith.constant 0 : index
      %25 = vector.load %arg7[%c0_21, %c0_22] : memref<16x128xbf16, #tpu.memory_space<vmem>>, vector<16x128xbf16>
      tpu.vector_store %arg7[%c0_21, %c0_22], %24 {strides = array<i32>} : memref<16x128xbf16, #tpu.memory_space<vmem>>, vector<16x128xbf16>,
    } else {
    }
    return
  }
  func.func @transform_0(%arg0: i32, %arg1: i32) -> (i32, i32) {
    %c0_i32 = arith.constant 0 : i32
    return %arg0, %arg1 : i32, i32
  }
  func.func @transform_1(%arg0: i32, %arg1: i32) -> (i32, i32) {
    %c0_i32 = arith.constant 0 : i32
    %c0_i32_0 = arith.constant 0 : i32
    return %arg1, %c0_i32 : i32, i32
  }
  func.func @transform_2(%arg0: i32, %arg1: i32) -> (i32, i32) {
    %c0_i32 = arith.constant 0 : i32
    %c0_i32_0 = arith.constant 0 : i32
    %c0_i32_1 = arith.constant 0 : i32
    return %c0_i32, %c0_i32_0 : i32, i32
  }
  func.func @transform_3(%arg0: i32, %arg1: i32) -> (i32, i32) {
    %c0_i32 = arith.constant 0 : i32
    %c0_i32_0 = arith.constant 0 : i32
    %c0_i32_1 = arith.constant 0 : i32
    return %c0_i32, %c0_i32_0 : i32, i32
  }
  func.func @transform_4(%arg0: i32, %arg1: i32) -> (i32, i32) {
    %c0_i32 = arith.constant 0 : i32
    %c0_i32_0 = arith.constant 0 : i32
    %c0_i32_1 = arith.constant 0 : i32
    return %c0_i32, %c0_i32_0 : i32, i32
  }
  func.func @transform_5(%arg0: i32, %arg1: i32) -> (i32, i32) {
    %c0_i32 = arith.constant 0 : i32
    %c0_i32_0 = arith.constant 0 : i32
    return %arg0, %c0_i32 : i32, i32
  }
}

</mosaic_0001>

<bundles_post_ra>
// kernel: tpu_custom_call.1
= control target key start
LH: loop header
LB: loop body
LE: loop exit
PB: predicated region body
PF: predicated region fallthrough
CT: control target
= control target key end

     0   :  { %v485_v1 = vmov 0.0   ;;  %vm486_vm0 = vmmov 0   ;;  %vm26_vm1 = vcmask 64512   ;;  %s619_s0 = inlined_call_operand.vmem [shape: bf16[16,128], index: 0, kind: input, shape index: {}]   ;;  %s620_s1 = inlined_call_operand.vmem [shape: bf16[128,8], index: 1, kind: input, shape index: {}]   ;;  %s621_s2 = inlined_call_operand.vmem [shape: bf16[8,128], index: 2, kind: input, shape index: {}]   ;;  %s622_s3 = inlined_call_operand.vmem [shape: f32[1,128], index: 3, kind: input, shape index: {}]   ;;  %s623_s4 = inlined_call_operand.vmem [shape: bf16[128,128], index: 4, kind: input, shape index: {}]   ;;  %s624_s5 = inlined_call_operand.hbm [shape: bf16[16,128], index: 5, kind: output, shape index: {}]  }
   0x1   :  { %v444_v0 = vld [vmem:[%s620_s1] sm:$0xff]   ;;  %393 = vmatprep.subr.bf16.mxu0 %v485_v1  ;;  %413 = vmatprep.subr.bf16.mxu1 %v485_v1  ;;  %v445_v2 = vld [vmem:[%s620_s1 + $0x8] sm:$0xff]   ;;  %27 = vst.msk [vmem:[#allocation2] sm:$0xff] %vm26_vm1, %v485_v1  ;;  %28 = vst.msk [vmem:[#allocation2 + $0x8] sm:$0xff] %vm26_vm1, %v485_v1 }
   0x2   :  { %394 = vmatpush3.bf16.msra.mxu0 %v444_v0  ;;  %409 = vmatprep.mubr.msk.bf16.mxu0 %vm486_vm0, %v485_v1  ;;  %v446_v3 = vld [vmem:[%s620_s1 + $0x10] sm:$0xff]   ;;  %v447_v4 = vld [vmem:[%s620_s1 + $0x18] sm:$0xff]   ;;  %v448_v5 = vld [vmem:[%s620_s1 + $0x20] sm:$0xff]  }
   0x3   :  { %395 = vmatprep.subr.bf16.mxu0 %v485_v1  ;;  %415 = vmatprep.mubr.msk.bf16.mxu1 %vm486_vm0, %v485_v1 }
   0x6   :  { %396 = vmatpush3.bf16.msra.mxu0 %v445_v2 }
   0x7   :  { %397 = vmatprep.subr.bf16.mxu0 %v485_v1 }
   0xa   :  { %398 = vmatpush3.bf16.msra.mxu0 %v446_v3 }
   0xb   :  { %399 = vmatprep.subr.bf16.mxu0 %v485_v1 }
   0xe   :  { %400 = vmatpush3.bf16.msra.mxu0 %v447_v4 }
   0xf   :  { %10 = vsyncpa [#allocation4], 0  ;;  %401 = vmatprep.subr.bf16.mxu0 %v485_v1  ;;  %v449_v6 = vld [vmem:[%s620_s1 + $0x28] sm:$0xff]   ;;  %v450_v7 = vld [vmem:[%s620_s1 + $0x30] sm:$0xff]   ;;  %vm166_vm2 = vcmask 1043456   ;;  %s487_s28 = smov [#allocation3]  }
  0x10   :  { %v451_v8 = vld [vmem:[%s620_s1 + $0x38] sm:$0xff]   ;;  %v452_v9 = vld [vmem:[%s619_s0] sm:$0xff]   ;;  %v30_v14 = vld [vmem:[#allocation2 + $0x8] sm:$0xff]  ;;  %s334_s29 = sshll.u32 %s487_s28, 4  ;;  %s335_s29 = int_to_ptr.vmem [resolvable:$true] %s334_s29 }
  0x11   :  { %v155_v10 = vld [vmem:[%s621_s2] sm:$0xf]  ;;  %v454_v24 = vld [vmem:[%s623_s4 + $0x8] sm:$0xff]   ;;  %v455_v25 = vld [vmem:[%s623_s4 + $0x10] sm:$0xff]   ;;  %p466_p1 = scmp.lt.s32.totalorder %s335_s29, %s335_s29 }
  0x12   :  { %402 = vmatpush3.bf16.msra.mxu0 %v448_v5  ;;  %v168_v11 = vsel %vm166_vm2, %v155_v10, 0  ;;  %v29_v12 = vld [vmem:[#allocation2] sm:$0xff]  ;;  %v456_v26 = vld [vmem:[%s623_s4 + $0x18] sm:$0xff]   ;;  %v458_v28 = vld [vmem:[%s623_s4 + $0x28] sm:$0xff]  }
  0x13   :  { %403 = vmatprep.subr.bf16.mxu0 %v485_v1  ;;  %414 = vmatpush3.bf16.msra.mxu1 %v168_v11  ;;  %v453_v22 = vld [vmem:[%s623_s4] sm:$0xff]   ;;  %v459_v29 = vld [vmem:[%s623_s4 + $0x30] sm:$0xff]   ;;  %v460_v30 = vld [vmem:[%s623_s4 + $0x38] sm:$0xff]  }
  0x14   :  { %419 = vmatprep.subr.bf16.mxu1 %v485_v1  ;;  %v457_v27 = vld [vmem:[%s623_s4 + $0x20] sm:$0xff]  }
  0x15   :  { %v354_v31 = vld [vmem:[%s622_s3] ss:$0 sm:$0xff]  ;;  %s461_s3 = scalar_lea.vmem %s335_s29, 128 }
  0x16   :  { %404 = vmatpush3.bf16.msra.mxu0 %v449_v6  ;;  %p462_p0 = scmp.ne.s32.totalorder %s335_s29, %s461_s3  ;;  %p467_p2 = scmp.lt.s32.totalorder %s461_s3, %s461_s3 }
  0x17   :  { %405 = vmatprep.subr.bf16.mxu0 %v485_v1 }
  0x18   :  { %p468_p3 = por %p467_p2, %p466_p1 }
  0x1a   :  { %406 = vmatpush3.bf16.msra.mxu0 %v450_v7  ;;  %p469_p4 = pnand %p468_p3, %p462_p0 }
  0x1b   :  { %407 = vmatprep.subr.bf16.mxu0 %v485_v1 }
  0x1e   :  { %408 = vmatpush3.bf16.msra.mxu0 %v451_v8 }
  0x21   :  { %410 = vmatmul.mubr.bf16.vlgmr.msra.gmra.mrb[0].mxu0 %v452_v9 }
  0xf4   :  { %v137_v13 = vpop.f32.mrb[0].mxu0 }
  0xf5   :  { %v144_v15 = vadd.f32 %v137_v13, %v29_v12  ;;  %v411_v16 = vpop.f32.mrb[1].mxu0 }
  0xf6   :  { %v140_v17 = vpop.f32.mrb[2].mxu0 }
  0xf7   :  { %147 = vst.msk [vmem:[#allocation2] sm:$0xff] %vm26_vm1, %v144_v15  ;;  %v145_v18 = vadd.f32 %v140_v17, %v30_v14  ;;  %v412_v19 = vpop.f32.mrb[3].mxu0 }
  0xf9   :  { %148 = vst.msk [vmem:[#allocation2 + $0x8] sm:$0xff] %vm26_vm1, %v145_v18 }
  0xfe   :  { %v152_v20 = vld [vmem:[#allocation2] sm:$0xff] }
 0x100   :  { %v153_v21 = vld [vmem:[#allocation2 + $0x8] sm:$0xff] }
 0x101   :  { %v154_v23 = vpack.c.bf16 %v153_v21, %v152_v20 }
 0x103   :  { %416 = vmatmul.mubr.msk.bf16.vlgmr.msra.gmra.mrb[0].mxu1 %vm26_vm1, %v154_v23 }
 0x104   :  { %420 = vmatpush3.bf16.msra.mxu1 %v453_v22  ;;  %435 = vmatprep.mubr.msk.bf16.mxu1 %vm486_vm0, %v485_v1 }
 0x105   :  { %421 = vmatprep.subr.bf16.mxu1 %v485_v1 }
 0x108   :  { %422 = vmatpush3.bf16.msra.mxu1 %v454_v24 }
 0x109   :  { %423 = vmatprep.subr.bf16.mxu1 %v485_v1 }
 0x10c   :  { %424 = vmatpush3.bf16.msra.mxu1 %v455_v25 }
 0x10d   :  { %425 = vmatprep.subr.bf16.mxu1 %v485_v1 }
 0x110   :  { %426 = vmatpush3.bf16.msra.mxu1 %v456_v26 }
 0x111   :  { %427 = vmatprep.subr.bf16.mxu1 %v485_v1 }
 0x114   :  { %428 = vmatpush3.bf16.msra.mxu1 %v457_v27 }
 0x115   :  { %429 = vmatprep.subr.bf16.mxu1 %v485_v1 }
 0x118   :  { %430 = vmatpush3.bf16.msra.mxu1 %v458_v28 }
 0x119   :  { %431 = vmatprep.subr.bf16.mxu1 %v485_v1 }
 0x11c   :  { %432 = vmatpush3.bf16.msra.mxu1 %v459_v29 }
 0x11d   :  { %433 = vmatprep.subr.bf16.mxu1 %v485_v1 }
 0x120   :  { %434 = vmatpush3.bf16.msra.mxu1 %v460_v30 }
 0x1d6   :  { %v204_v32 = vpop.f32.mrb[0].mxu1 }
 0x1d7   :  { %v205_v33 = vadd.f32 %v354_v31, %v204_v32  ;;  %v417_v34 = vpop.f32.mrb[1].mxu1 }
 0x1d8   :  { %v207_v35 = vpop.f32.mrb[2].mxu1 }
 0x1d9   :  { %v208_v36 = vadd.f32 %v354_v31, %v207_v35  ;;  %v418_v37 = vpop.f32.mrb[3].mxu1  ;;  %v211_v38 = vmax.f32 %v205_v33, 0.0 }
 0x1db   :  { %v212_v39 = vmax.f32 %v208_v36, 0.0 }
 0x1dd   :  { %v213_v40 = vpack.c.bf16 %v212_v39, %v211_v38 }
 0x1df   :  { %436 = vmatmul.mubr.bf16.vlgmr.msra.gmra.mrb[4].mxu1 %v213_v40 }
 0x2b2   :  { %v312_v41 = vpop.f32.mrb[4].mxu1 }
 0x2b3   :  { %v437_v42 = vpop.f32.mrb[5].mxu1 }
 0x2b4   :  { %v315_v43 = vpop.f32.mrb[6].mxu1 }
 0x2b5   :  { %v371_v44 = vpack.c.bf16 %v315_v43, %v312_v41  ;;  %v438_v45 = vpop.f32.mrb[7].mxu1 }
 0x2b7   :  { %372 = vst [vmem:[#allocation3] sm:$0xff] %v371_v44  }
 0x2b8   :  { %472 = shalt.err (!%p469_p4)
}
 0x2b9   :  { %s473_s6 = scalar_lea.hbm %s624_s5, 128 }
 0x2ba   :  { %p474_p5 = scmp.ne.s32.totalorder %s624_s5, %s473_s6  ;;  %p477_p6 = scmp.lt.u32.totalorder %s473_s6, %s624_s5 }
 0x2bc   :  { %p479_p7 = pnand %p477_p6, %p474_p5 }
 0x2be   :  { %482 = shalt.err (!%p479_p7)
}
 0x2bf   :  { %s488_s11 = smov 64   ;;  %s489_s12 = smov 4  }
 0x2c0   :  { %340 = dma.vmem_to_hbm [thread:$0]  %s335_s29, 128, %s624_s5, [#allocation4], %s488_s11, %s488_s11, %s489_s12  }
 0x2c1   :  { %483 = dma.done.wait [#allocation4], 128  }
 0x2c2   :  { %484 = vsyncadd [#allocation4], 4294967168 }
 0x2c3   :  { %344 = vsyncpa [#allocation4], 1 }

</bundles_post_ra>
